<compile_context>
chip_gen: v7x
topology: tpu7x:2x2x1
jax: 0.10.0
libtpu: 0.0.40
codegen_flags: <defaults>
</compile_context>

<pallas_src>
import functools

import jax
import jax.numpy as jnp
from jax.experimental import pallas as pl
from jax.experimental.pallas import tpu as pltpu


def make_divisible(v, divisor=8, min_value=None):
    min_value = min_value or divisor
    new_v = max(min_value, int(v + divisor / 2) // divisor * divisor)
    if new_v < 0.9 * v:
        new_v += divisor
    return new_v


# --------------------------------------------------------------------------- kernel


def se_kernel(x_ref, w1t_ref, b1_ref, w2t_ref, b2_ref, o_ref, *, inv_hw):
    """x_ref/o_ref: (TB, Cg, HW) native dtype; w1t: (Cg, Crg); b1: (1, Crg);
    w2t: (Crg, Cg); b2: (1, Cg).  Cg = g*C (batch-folded channels)."""
    # --- squeeze: global average pool over the lane (spatial) axis.
    #     f32 accumulate; multiply by the baked-in 1/HW instead of dividing.
    s = jnp.sum(x_ref[...].astype(jnp.float32), axis=-1) * jnp.float32(inv_hw)  # (TB, Cg)

    # --- 1x1 conv_reduce + ReLU, then 1x1 conv_expand (tiny f32 dots).
    # NOTE: for tiny C/Cr these dots are pure latency (near-zero FLOPs) and sit
    # fully under the x-tile DMA shadow, so the simple MXU form is kept.
    r = jnp.dot(s, w1t_ref[...], preferred_element_type=jnp.float32) + b1_ref[...]
    r = jnp.maximum(r, 0.0)                                                     # (TB, Crg)
    e = jnp.dot(r, w2t_ref[...], preferred_element_type=jnp.float32) + b2_ref[...]

    # --- sigmoid gate; re-read x_ref for the multiply instead of keeping the tile
    #     (or its f32 cast) live across the serialized FC chain.
    gate = jax.nn.sigmoid(e).astype(o_ref.dtype)                                # (TB, Cg)
    o_ref[...] = x_ref[...] * gate[:, :, None]                                  # (TB, Cg, HW)


# ------------------------------------------------------------------ sizing heuristics


def _tpu_budget():
    """(physical VMEM bytes per TensorCore, TensorCores per chip); conservative fallbacks."""
    vmem_cap = 64 << 20          # v7x per-TC value; conservative for v5e/v6e (128 MiB)
    num_tc = 1
    try:
        info = pltpu.get_tpu_info()
        for name in ("vmem_capacity_bytes", "vmem_bytes", "vmem_size_bytes"):
            v = getattr(info, name, None)
            if isinstance(v, int) and v > 0:
                vmem_cap = v
                break
        for name in ("num_cores", "core_count", "tensorcore_count", "num_tensorcores"):
            v = getattr(info, name, None)
            if isinstance(v, int) and v > 0:
                num_tc = v
                break
    except Exception:
        pass
    try:
        kind = jax.devices()[0].device_kind.lower()
        if "v5" in kind or "v6" in kind:
            num_tc = 1
        elif "7" in kind:
            num_tc = max(num_tc, 2)
    except Exception:
        pass
    return max(vmem_cap, 32 << 20), max(num_tc, 1)


def _padded_vmem_bytes(rows, cols, dtype):
    """VMEM footprint of a (rows, cols) slab after (sublane, lane) padding."""
    item = jnp.dtype(dtype).itemsize
    sub = max(8, 32 // item)                     # 8 f32, 16 bf16, 32 int8 sublanes/tile
    return (-(-rows // sub) * sub) * (-(-cols // 128) * 128) * item


def _choose_channel_fold(B, C, dtype, num_tc):
    """Fold g batches into the channel axis when C under-fills the sublane tile,
    keeping at least one grid step per TensorCore."""
    item = jnp.dtype(dtype).itemsize
    pack = max(8, 32 // item)
    if C >= pack:
        return 1
    cands = [g for g in range(1, B + 1)
             if B % g == 0 and g * C <= pack and (B // g) >= min(B, num_tc)]
    return max(cands) if cands else 1


def _choose_batch_tile(num_batches, bytes_per_batch, target_tile_bytes, num_tc):
    """Largest batch tile (divisor of num_batches) fitting the byte target, preferring
    >= 2 evenly-split grid steps per TensorCore on multi-TC chips."""
    divisors = [d for d in range(1, num_batches + 1) if num_batches % d == 0]
    fitting = [d for d in divisors if d * bytes_per_batch <= target_tile_bytes]
    if not fitting:
        return 1                     # single batch per tile; caller grows vmem_limit
    if num_tc <= 1:
        return max(fitting)          # single TC: biggest tile amortizes step overhead
    for ok in (
        lambda tb: (num_batches // tb) >= 2 * num_tc and (num_batches // tb) % num_tc == 0,
        lambda tb: (num_batches // tb) >= num_tc and (num_batches // tb) % num_tc == 0,
        lambda tb: True,
    ):
        cands = [tb for tb in fitting if ok(tb)]
        if cands:
            return max(cands)
    return max(fitting)


# ----------------------------------------------------------------------------- wrapper


def squeeze_excite(x_nchw, w1, b1, w2, b2):
    """x_nchw: (B, C, H, W); w1: (Cr, C); b1: (Cr,); w2: (C, Cr); b2: (C,)."""
    B, C, H, W = x_nchw.shape
    Cr = w1.shape[0]
    HW = H * W
    dtype = x_nchw.dtype
    itemsize = jnp.dtype(dtype).itemsize

    vmem_cap, num_tc = _tpu_budget()

    # --- small-C sublane packing: fold g batches into the channel axis (free reshape).
    g = _choose_channel_fold(B, C, dtype, num_tc)
    Bg, Cg, Crg = B // g, g * C, g * Cr
    x = x_nchw.reshape(Bg, Cg, HW)               # contiguous leading-dim split: no copy

    # Pre-transpose weights once; expand block-diagonally when batches are folded.
    w1t = jnp.asarray(w1, jnp.float32).T         # (C, Cr)
    w2t = jnp.asarray(w2, jnp.float32).T         # (Cr, C)
    b1f = jnp.asarray(b1, jnp.float32)
    b2f = jnp.asarray(b2, jnp.float32)
    if g > 1:
        eye_g = jnp.eye(g, dtype=jnp.float32)
        w1t = jnp.kron(eye_g, w1t)               # (Cg, Crg) block-diagonal
        w2t = jnp.kron(eye_g, w2t)               # (Crg, Cg) block-diagonal
        b1f = jnp.tile(b1f, g)
        b2f = jnp.tile(b2f, g)
    b1_2d = b1f.reshape(1, Crg)
    b2_2d = b2f.reshape(1, Cg)

    # --- VMEM budget & batch-tile choice (generation aware).
    per_batch = _padded_vmem_bytes(Cg, HW, dtype)
    weights_vmem = 2 * (_padded_vmem_bytes(Cg, Crg, jnp.float32)
                        + _padded_vmem_bytes(Crg, Cg, jnp.float32)
                        + _padded_vmem_bytes(1, Crg, jnp.float32)
                        + _padded_vmem_bytes(1, Cg, jnp.float32))   # 2x: double-buffered
    # Weights/biases are grid-invariant (constant index_map) so they are DMA'd once;
    # their double-buffer waste is charged to the budget here rather than using
    # pipeline_mode=pl.Buffered(1).

    vmem_limit = min(vmem_cap // 2, 64 << 20)    # 32 MiB on 64 MiB/TC (v7x); 64 MiB on 128 MiB
    target_tile = (vmem_limit - weights_vmem - (1 << 20)) // 4   # in+out, double-buffered
    target_tile = max(min(target_tile, 8 << 20), per_batch)

    TB = _choose_batch_tile(Bg, per_batch, target_tile, num_tc)
    grid = (Bg // TB,)

    needed = 4 * TB * per_batch + weights_vmem + (1 << 20)
    if needed > vmem_limit:
        # A single batch already exceeds the budget (huge single-image activations):
        # grow the limit toward physical VMEM so it still compiles where possible.
        # TODO(synk): split the spatial axis over an "arbitrary" grid dim with a
        # partial-sum accumulator if even one batch does not fit in VMEM.
        vmem_limit = min(needed, vmem_cap)

    kernel = functools.partial(se_kernel, inv_hw=1.0 / HW)

    cost = pl.CostEstimate(
        flops=int(3 * B * C * HW + 4 * B * C * Cr),            # reduce + gate + tiny FCs
        transcendentals=int(B * C),                             # sigmoid
        bytes_accessed=int(2 * B * C * HW * itemsize + 8 * C * Cr),  # read + write x
    )

    out = pl.pallas_call(
        kernel,
        out_shape=jax.ShapeDtypeStruct((Bg, Cg, HW), dtype),
        grid_spec=pltpu.PrefetchScalarGridSpec(
            num_scalar_prefetch=0,
            grid=grid,
            in_specs=[
                pl.BlockSpec((TB, Cg, HW), lambda b: (b, 0, 0)),   # full-extent last dims
                pl.BlockSpec((Cg, Crg), lambda b: (0, 0)),
                pl.BlockSpec((1, Crg), lambda b: (0, 0)),
                pl.BlockSpec((Crg, Cg), lambda b: (0, 0)),
                pl.BlockSpec((1, Cg), lambda b: (0, 0)),
            ],
            out_specs=pl.BlockSpec((TB, Cg, HW), lambda b: (b, 0, 0)),
        ),
        compiler_params=pltpu.CompilerParams(
            dimension_semantics=("parallel",),
            vmem_limit_bytes=int(vmem_limit),
        ),
        cost_estimate=cost,
    )(x, w1t, b1_2d, w2t, b2_2d)

    # (Bg, Cg, HW) and (B, C, H, W) are the same contiguous buffer: free reshape back.
    return out.reshape(B, C, H, W)


# --------------------------------------------------------------------------- reference


def squeeze_excite_ref(x, w1, b1, w2, b2):
    # Pure-JAX reference mirroring the PyTorch forward.
    s = jnp.mean(x.astype(jnp.float32), axis=(2, 3))           # (B, C)
    r = jnp.maximum(s @ w1.T.astype(jnp.float32) + b1, 0.0)    # (B, Cr)
    e = r @ w2.T.astype(jnp.float32) + b2                      # (B, C)
    g = jax.nn.sigmoid(e).astype(x.dtype)
    return x * g[:, :, None, None]


if __name__ == "__main__":
    # Module config: in_channel=4, se_ratio=0.25, divisor=1 -> reduced_chs=1
    B, C, H, W = 2, 4, 16, 16
    Cr = make_divisible(C * 0.25, 1)

    key = jax.random.PRNGKey(0)
    kx, k1, k2, k3, k4 = jax.random.split(key, 5)
    x = jax.random.normal(kx, (B, C, H, W), dtype=jnp.float32)
    # conv_reduce: Conv2d(C, Cr, 1, bias=True) -> weight (Cr, C), bias (Cr,)
    w1 = jax.random.normal(k1, (Cr, C), dtype=jnp.float32) * 0.5
    b1 = jax.random.normal(k2, (Cr,), dtype=jnp.float32) * 0.1
    # conv_expand: Conv2d(Cr, C, 1, bias=True) -> weight (C, Cr), bias (C,)
    w2 = jax.random.normal(k3, (C, Cr), dtype=jnp.float32) * 0.5
    b2 = jax.random.normal(k4, (C,), dtype=jnp.float32) * 0.1

    out = jax.block_until_ready(squeeze_excite(x, w1, b1, w2, b2))
    ref = squeeze_excite_ref(x, w1, b1, w2, b2)

    assert out.shape == (B, C, H, W)
    assert out.dtype == x.dtype
    assert jnp.allclose(out, ref, atol=1e-5, rtol=1e-5)

    print("KERNEL_OK")
</pallas_src>

<mosaic_0001>
module attributes {stable_mosaic.version = 11 : i64} {
  func.func @se_kernel(%arg0: i32, %arg1: memref<1x8x256xf32, #tpu.memory_space<vmem>>, %arg2: memref<8x2xf32, #tpu.memory_space<vmem>>, %arg3: memref<1x2xf32, #tpu.memory_space<vmem>>, %arg4: memref<2x8xf32, #tpu.memory_space<vmem>>, %arg5: memref<1x8xf32, #tpu.memory_space<vmem>>, %arg6: memref<1x8x256xf32, #tpu.memory_space<vmem>>) attributes {dimension_semantics = [#tpu.dimension_semantics<parallel>], iteration_bounds = array<i64: 1>, scalar_prefetch = 0 : i64, scratch_operands = 0 : i64, tpu.core_type = #tpu.core_type<tc>, window_params = [{transform_indices = @transform_0, window_bounds = array<i64: 1, 8, 256>}, {pipeline_mode = #tpu.pipeline_mode<synchronous>, transform_indices = @transform_1, window_bounds = array<i64: 8, 2>}, {pipeline_mode = #tpu.pipeline_mode<synchronous>, transform_indices = @transform_2, window_bounds = array<i64: 1, 2>}, {pipeline_mode = #tpu.pipeline_mode<synchronous>, transform_indices = @transform_3, window_bounds = array<i64: 2, 8>}, {pipeline_mode = #tpu.pipeline_mode<synchronous>, transform_indices = @transform_4, window_bounds = array<i64: 1, 8>}, {transform_indices = @transform_5, window_bounds = array<i64: 1, 8, 256>}]} {
    %c0 = arith.constant 0 : index
    %c0_0 = arith.constant 0 : index
    %c0_1 = arith.constant 0 : index
    %0 = vector.load %arg1[%c0, %c0_0, %c0_1] : memref<1x8x256xf32, #tpu.memory_space<vmem>>, vector<1x8x256xf32>
    %cst = arith.constant dense<0.000000e+00> : vector<1x8xf32>
    %1 = vector.multi_reduction <add>, %0, %cst [2] : vector<1x8x256xf32> to vector<1x8xf32>
    %cst_2 = arith.constant 3.906250e-03 : f32
    %2 = vector.broadcast %cst_2 : f32 to vector<1x8xf32>
    %3 = arith.mulf %1, %2 : vector<1x8xf32>
    %c0_3 = arith.constant 0 : index
    %c0_4 = arith.constant 0 : index
    %4 = vector.load %arg2[%c0_3, %c0_4] : memref<8x2xf32, #tpu.memory_space<vmem>>, vector<8x2xf32>
    %cst_5 = arith.constant dense<0.000000e+00> : vector<1x2xf32>
    %5 = tpu.matmul %3, %4, %cst_5 {dimension_numbers = #tpu.dot_dimension_numbers<[1], [0], [0], [1], [0, 0, 1, 1], [], []>} : vector<1x8xf32>, vector<8x2xf32>, vector<1x2xf32> -> vector<1x2xf32>
    %c0_6 = arith.constant 0 : index
    %c0_7 = arith.constant 0 : index
    %6 = vector.load %arg3[%c0_6, %c0_7] : memref<1x2xf32, #tpu.memory_space<vmem>>, vector<1x2xf32>
    %7 = arith.addf %5, %6 : vector<1x2xf32>
    %cst_8 = arith.constant 0.000000e+00 : f32
    %8 = vector.broadcast %cst_8 : f32 to vector<1x2xf32>
    %9 = arith.maximumf %7, %8 : vector<1x2xf32>
    %c0_9 = arith.constant 0 : index
    %c0_10 = arith.constant 0 : index
    %10 = vector.load %arg4[%c0_9, %c0_10] : memref<2x8xf32, #tpu.memory_space<vmem>>, vector<2x8xf32>
    %cst_11 = arith.constant dense<0.000000e+00> : vector<1x8xf32>
    %11 = tpu.matmul %9, %10, %cst_11 {dimension_numbers = #tpu.dot_dimension_numbers<[1], [0], [0], [1], [0, 0, 1, 1], [], []>} : vector<1x2xf32>, vector<2x8xf32>, vector<1x8xf32> -> vector<1x8xf32>
    %c0_12 = arith.constant 0 : index
    %c0_13 = arith.constant 0 : index
    %12 = vector.load %arg5[%c0_12, %c0_13] : memref<1x8xf32, #tpu.memory_space<vmem>>, vector<1x8xf32>
    %13 = arith.addf %11, %12 : vector<1x8xf32>
    %14 = arith.negf %13 : vector<1x8xf32>
    %15 = math.exp %14 : vector<1x8xf32>
    %cst_14 = arith.constant 1.000000e+00 : f32
    %16 = vector.broadcast %cst_14 : f32 to vector<1x8xf32>
    %17 = arith.addf %16, %15 : vector<1x8xf32>
    %18 = arith.divf %16, %17 : vector<1x8xf32>
    %c0_15 = arith.constant 0 : index
    %c0_16 = arith.constant 0 : index
    %c0_17 = arith.constant 0 : index
    %19 = vector.load %arg1[%c0_15, %c0_16, %c0_17] : memref<1x8x256xf32, #tpu.memory_space<vmem>>, vector<1x8x256xf32>
    %20 = vector.shape_cast %18 : vector<1x8xf32> to vector<1x8x1xf32>
    %21 = vector.broadcast %20 : vector<1x8x1xf32> to vector<1x8x256xf32>
    %22 = arith.mulf %19, %21 : vector<1x8x256xf32>
    %c0_18 = arith.constant 0 : index
    %c0_19 = arith.constant 0 : index
    %c0_20 = arith.constant 0 : index
    %23 = vector.load %arg6[%c0_18, %c0_19, %c0_20] : memref<1x8x256xf32, #tpu.memory_space<vmem>>, vector<1x8x256xf32>
    tpu.vector_store %arg6[%c0_18, %c0_19, %c0_20], %22 {strides = array<i32>} : memref<1x8x256xf32, #tpu.memory_space<vmem>>, vector<1x8x256xf32>,
    return
  }
  func.func @transform_0(%arg0: i32) -> (i32, i32, i32) {
    %c0_i32 = arith.constant 0 : i32
    %c0_i32_0 = arith.constant 0 : i32
    %c0_i32_1 = arith.constant 0 : i32
    return %arg0, %c0_i32, %c0_i32_0 : i32, i32, i32
  }
  func.func @transform_1(%arg0: i32) -> (i32, i32) {
    %c0_i32 = arith.constant 0 : i32
    %c0_i32_0 = arith.constant 0 : i32
    %c0_i32_1 = arith.constant 0 : i32
    return %c0_i32, %c0_i32_0 : i32, i32
  }
  func.func @transform_2(%arg0: i32) -> (i32, i32) {
    %c0_i32 = arith.constant 0 : i32
    %c0_i32_0 = arith.constant 0 : i32
    %c0_i32_1 = arith.constant 0 : i32
    return %c0_i32, %c0_i32_0 : i32, i32
  }
  func.func @transform_3(%arg0: i32) -> (i32, i32) {
    %c0_i32 = arith.constant 0 : i32
    %c0_i32_0 = arith.constant 0 : i32
    %c0_i32_1 = arith.constant 0 : i32
    return %c0_i32, %c0_i32_0 : i32, i32
  }
  func.func @transform_4(%arg0: i32) -> (i32, i32) {
    %c0_i32 = arith.constant 0 : i32
    %c0_i32_0 = arith.constant 0 : i32
    %c0_i32_1 = arith.constant 0 : i32
    return %c0_i32, %c0_i32_0 : i32, i32
  }
  func.func @transform_5(%arg0: i32) -> (i32, i32, i32) {
    %c0_i32 = arith.constant 0 : i32
    %c0_i32_0 = arith.constant 0 : i32
    %c0_i32_1 = arith.constant 0 : i32
    return %arg0, %c0_i32, %c0_i32_0 : i32, i32, i32
  }
}

</mosaic_0001>

<bundles_post_ra>
// kernel: tpu_custom_call.1
= control target key start
LH: loop header
LB: loop body
LE: loop exit
PB: predicated region body
PF: predicated region fallthrough
CT: control target
= control target key end

     0   :  { %10 = vsyncpa [#allocation3], 0  ;;  %s378_s0 = inlined_call_operand.hbm [shape: f32[1,8,256], index: 0, kind: input, shape index: {}]   ;;  %s379_s1 = inlined_call_operand.vmem [shape: f32[8,2], index: 1, kind: input, shape index: {}]   ;;  %s380_s2 = inlined_call_operand.vmem [shape: f32[1,2], index: 2, kind: input, shape index: {}]   ;;  %s381_s3 = inlined_call_operand.vmem [shape: f32[2,8], index: 3, kind: input, shape index: {}]   ;;  %s382_s4 = inlined_call_operand.vmem [shape: f32[1,8], index: 4, kind: input, shape index: {}]   ;;  %s383_s5 = inlined_call_operand.hbm [shape: f32[1,8,256], index: 5, kind: output, shape index: {}]  }
   0x1   :  { %11 = vsyncpa [#allocation4], 0  ;;  %s308_s18 = smov [#allocation2]   ;;  %s260_s22 = scalar_lea.hbm %s378_s0, 256 }
   0x2   :  { %s18_s19 = sshll.u32 %s308_s18, 4  ;;  %p261_p0 = scmp.ne.s32.totalorder %s378_s0, %s260_s22  ;;  %s19_s19 = int_to_ptr.vmem [resolvable:$true] %s18_s19 }
   0x3   :  { %p264_p1 = scmp.lt.u32.totalorder %s260_s22, %s378_s0 }
   0x5   :  { %p266_p2 = pnand %p264_p1, %p261_p0 }
   0x7   :  { %269 = shalt.err (!%p266_p2)
}
   0x8   :  { %s270_s27 = scalar_lea.vmem %s19_s19, 256  ;;  %p275_p4 = scmp.lt.s32.totalorder %s19_s19, %s19_s19 }
   0x9   :  { %p271_p3 = scmp.ne.s32.totalorder %s19_s19, %s270_s27  ;;  %p276_p5 = scmp.lt.s32.totalorder %s270_s27, %s270_s27 }
   0xb   :  { %p277_p6 = por %p276_p5, %p275_p4 }
   0xd   :  { %p278_p7 = pnand %p277_p6, %p271_p3 }
   0xf   :  { %281 = shalt.err (!%p278_p7)
}
  0x10   :  { %21 = dma.hbm_to_vmem [thread:$0]  %s378_s0, 256, %s19_s19, [#allocation3]  }
  0x11   :  { %304 = dma.done.wait [#allocation3], 256  }
  0x12   :  { %305 = vsyncadd [#allocation3], 4294967040  ;;  %v33_v0 = vld [vmem:[#allocation2] sm:$0xff]  ;;  %v34_v1 = vld [vmem:[#allocation2 + $0x8] sm:$0xff]  ;;  %v309_v3 = vmov 0.0   ;;  %vm310_vm0 = vmmov 0   ;;  %v42_v5 = vlaneseq }
  0x13   :  { %v35_v2 = vadd.f32 %v34_v1, %v33_v0  ;;  %242 = vmatprep.subr.mxu0 %v309_v3  ;;  %v39_v4 = vld [vmem:[%s379_s1] sm:$0xff]  ;;  %247 = vmatprep.subr.mxu1 %v309_v3  ;;  %vm48_vm1 = vcmask 64512   ;;  %vm128_vm2 = vcmask 1041408   ;;  %vm124_vm3 = vcmask 15360  }
  0x14   :  { %243 = vmatpush3.msra.mxu0 %v39_v4  ;;  %244 = vmatprep.mubr.msk.f32.mxu0 %vm310_vm0, %v309_v3  ;;  %v43_v6 = vand.u32 127, %v42_v5  ;;  %v45_v7 = vshrl.u32 %v42_v5, 7  ;;  %v122_v12 = vld [vmem:[%s381_s3] sm:$0x3] }
  0x15   :  { %36 = vadd.xlane.f32.xlu0 %v35_v2  ;;  %249 = vmatprep.mubr.msk.f32.mxu1 %vm310_vm0, %v309_v3  ;;  %v40_v13 = vld [vmem:[%s380_s2] sm:$0x1]  ;;  %s311_s2 = smov [#allocation5]  }
  0x16   :  { %v46_v8 = vsub.s32 %v43_v6, %v45_v7  ;;  %248 = vmatpush3.msk.msra.mxu1 %vm128_vm2, %v122_v12  ;;  %v123_v18 = vld [vmem:[%s382_s4] sm:$0x1]  ;;  %v210_v25 = vsub.s32 0, %v45_v7  ;;  %s225_s3 = sshll.u32 %s311_s2, 4  ;;  %s226_s3 = int_to_ptr.vmem [resolvable:$true] %s225_s3 }
  0x17   :  { %s282_s4 = scalar_lea.vmem %s226_s3, 256  ;;  %p287_p9 = scmp.lt.s32.totalorder %s226_s3, %s226_s3 }
  0x18   :  { %p283_p8 = scmp.ne.s32.totalorder %s226_s3, %s282_s4  ;;  %p288_p10 = scmp.lt.s32.totalorder %s282_s4, %s282_s4 }
  0x1a   :  { %p289_p11 = por %p288_p10, %p287_p9 }
  0x1c   :  { %p290_p12 = pnand %p289_p11, %p283_p8 }
  0xa2   :  { %v37_v9 = vpop.xlane.xlu0 %36 }
  0xa3   :  { %v38_v10 = vmul.f32 0.00390625, %v37_v9 }
  0xa5   :  { %v47_v11 = vrot.slane %v38_v10, %v46_v8 }
  0xa7   :  { %245 = vmatmul.mubr.msk.f32.vlgmr.msra.gmra.mrb[0].mxu0 %vm48_vm1, %v47_v11 }
 0x17a   :  { %v117_v14 = vpop.f32.mrb[0].mxu0 }
 0x17b   :  { %v118_v15 = vadd.f32 %v117_v14, %v40_v13  ;;  %v246_v16 = vpop.f32.mrb[1].mxu0 }
 0x17d   :  { %v121_v17 = vmax.f32 %v118_v15, 0.0 }
 0x17f   :  { %250 = vmatmul.mubr.msk.f32.vlgmr.msra.gmra.mrb[0].mxu1 %vm124_vm3, %v121_v17 }
 0x252   :  { %v198_v19 = vpop.f32.mrb[0].mxu1 }
 0x253   :  { %v199_v20 = vadd.f32 %v198_v19, %v123_v18  ;;  %v251_v21 = vpop.f32.mrb[1].mxu1 }
 0x255   :  { %v237_v22 = vmul.f32 -1.442695, %v199_v20 }
 0x257   :  { %256 = vpow2.f32 %v237_v22 }
 0x261   :  { %v257_v23 = vpop.eup %256 }
 0x262   :  { %v205_v24 = vadd.f32 1.0, %v257_v23 }
 0x264   :  { %258 = vrcp.f32 %v205_v24 }
 0x26e   :  { %v259_v26 = vpop.eup %258 }
 0x26f   :  { %v211_v27 = vrot.slane %v259_v26, %v210_v25 }
 0x271   :  { %213 = vbcast.lane.b32.xlu0 %v211_v27, 256 }
 0x2e3   :  { %v214_v28 = vpop.permute.xlu0 %213 }
 0x2e4   :  { %v215_v29 = vmul.f32 %v214_v28, %v33_v0  ;;  %v216_v30 = vmul.f32 %v214_v28, %v34_v1 }
 0x2e6   :  { %217 = vst [vmem:[#allocation5] sm:$0xff] %v215_v29  ;;  %218 = vst [vmem:[#allocation5 + $0x8] sm:$0xff] %v216_v30 }
 0x2e7   :  { %293 = shalt.err (!%p290_p12)
}
 0x2e8   :  { %s294_s13 = scalar_lea.hbm %s383_s5, 256 }
 0x2e9   :  { %p295_p13 = scmp.ne.s32.totalorder %s383_s5, %s294_s13  ;;  %p298_p0 = scmp.lt.u32.totalorder %s294_s13, %s383_s5 }
 0x2eb   :  { %p300_p1 = pnand %p298_p0, %p295_p13 }
 0x2ed   :  { %303 = shalt.err (!%p300_p1)
}
 0x2ee   :  { %228 = dma.vmem_to_hbm [thread:$0]  %s226_s3, 256, %s383_s5, [#allocation4]  }
 0x2ef   :  { %306 = dma.done.wait [#allocation4], 256  }
 0x2f0   :  { %307 = vsyncadd [#allocation4], 4294967040 }
 0x2f1   :  { %232 = vsyncpa [#allocation3], 1 }
 0x2f2   :  { %233 = vsyncpa [#allocation4], 1 }

</bundles_post_ra>
